<compile_context>
chip_gen: v6e
topology: v6e:2x2x1
jax: 0.10.0
libtpu: 0.0.40
codegen_flags: <defaults>
</compile_context>

<pallas_src>
import jax
import jax.numpy as jnp
from jax.experimental import pallas as pl
from jax.experimental.pallas import tpu as pltpu

# ----------------------- small shapes consistent with the module -----------------------
B = 2          # batch
C = 32         # channels (ChannelGate reduction=16 => mid = C//16 = 2, non-degenerate)
H = 8          # spatial height
W = 16         # spatial width
S = H * W      # 128 -> lane-dense
RED = 16       # ChannelGate_sub reduction (PyTorch default)
MID = C // RED # 2
EPS = 1e-5     # nn.LayerNorm default eps


def _sfru_kernel(x_ref, ln_ref, cw_ref, gm_ref, gv_ref, o_ref):
    """One sample per grid step.  x_ref/o_ref: (C, S).  Params:
       ln_ref (2, C, S)        : [layernorm weight, layernorm bias] (flattened over H,W)
       cw_ref (2, C, C)        : [conv_wise_1, conv_wise_2] 1x1 weights
       gm_ref (C, 2*MID+1)     : [fc1_w^T | fc2_w | fc2_b]
       gv_ref (3, MID)         : [fc1_b ; norm1 weight ; norm1 bias]
    """
    sig = jax.nn.sigmoid
    x = x_ref[...]                                   # (C, S)
    ln_w = ln_ref[0]                                 # (C, S)
    ln_b = ln_ref[1]

    # ---------------- LayerNorm over [C, H, W] (per sample), then SiLU-style gating ----------------
    mu = jnp.mean(jnp.mean(x, axis=1, keepdims=True), axis=0, keepdims=True)        # (1, 1)
    d = x - mu
    var = jnp.mean(jnp.mean(d * d, axis=1, keepdims=True), axis=0, keepdims=True)   # (1, 1)
    x_la = d * jax.lax.rsqrt(var + EPS) * ln_w + ln_b
    x_out = x_la * sig(ln_w * x_la)

    # ---------------- ChannelGate_sub ----------------
    gap = jnp.mean(x_out, axis=1, keepdims=True)                                    # (C, 1)
    fc1_wT = gm_ref[:, 0:MID]                                                       # (C, MID)
    fc2_w = gm_ref[:, MID:2 * MID]                                                  # (C, MID)
    fc2_b = gm_ref[:, 2 * MID:2 * MID + 1]                                          # (C, 1)
    fc1_b = gv_ref[0:1]                                                             # (1, MID)
    n1_w = gv_ref[1:2]                                                              # (1, MID)
    n1_b = gv_ref[2:3]                                                              # (1, MID)

    # fc1 (1x1 conv C -> MID) on the pooled vector
    y = jnp.sum(fc1_wT * gap, axis=0, keepdims=True) + fc1_b                        # (1, MID)
    # LayerNorm([MID, 1, 1]) over the MID gate channels
    my = jnp.mean(y, axis=1, keepdims=True)
    dy = y - my
    vy = jnp.mean(dy * dy, axis=1, keepdims=True)
    y = dy * jax.lax.rsqrt(vy + EPS) * n1_w + n1_b
    y = jnp.maximum(y, 0.0)                                                         # ReLU
    # fc2 (1x1 conv MID -> C) + sigmoid
    gate = sig(jnp.sum(fc2_w * y, axis=1, keepdims=True) + fc2_b)                   # (C, 1)

    # ---------------- conv_wise_1 / conv_wise_2 (1x1 convs) as MXU matmuls ----------------
    x1 = x_out * gate
    x2 = x_out * (1.0 - gate)
    xo1 = jnp.dot(cw_ref[0], x1, preferred_element_type=jnp.float32)                # (C, S)
    xo2 = jnp.dot(cw_ref[1], x2, preferred_element_type=jnp.float32)                # (C, S)

    o_ref[...] = x_out * sig(xo1 * xo2)


def init_params(key):
    ks = jax.random.split(key, 10)

    def rnd(i, shape, scale=0.3):
        return (scale * jax.random.normal(ks[i], shape)).astype(jnp.float32)

    p = {}
    p["ln_w"] = 1.0 + rnd(0, (C, H, W), 0.1)   # nn.LayerNorm([C, H, W]) weight
    p["ln_b"] = rnd(1, (C, H, W), 0.1)
    p["fc1_w"] = rnd(2, (MID, C))              # Conv2d(C, MID, 1, bias=True)
    p["fc1_b"] = rnd(3, (MID,), 0.1)
    p["n1_w"] = 1.0 + rnd(4, (MID,), 0.1)      # nn.LayerNorm([MID, 1, 1])
    p["n1_b"] = rnd(5, (MID,), 0.1)
    p["fc2_w"] = rnd(6, (C, MID))              # Conv2d(MID, C, 1, bias=True)
    p["fc2_b"] = rnd(7, (C,), 0.1)
    p["cw1"] = rnd(8, (C, C))                  # conv_wise_1 (1x1, no bias)
    p["cw2"] = rnd(9, (C, C))                  # conv_wise_2 (1x1, no bias)
    return p


def pack_params(p):
    """Pack the small parameter tensors into 4 VMEM slabs (layout plumbing only)."""
    ln = jnp.stack([p["ln_w"].reshape(C, S), p["ln_b"].reshape(C, S)]).astype(jnp.float32)   # (2, C, S)
    cw = jnp.stack([p["cw1"], p["cw2"]]).astype(jnp.float32)                                 # (2, C, C)
    gm = jnp.concatenate([p["fc1_w"].T, p["fc2_w"], p["fc2_b"][:, None]],
                         axis=1).astype(jnp.float32)                                         # (C, 2*MID+1)
    gv = jnp.stack([p["fc1_b"], p["n1_w"], p["n1_b"]]).astype(jnp.float32)                   # (3, MID)
    return ln, cw, gm, gv


@jax.jit
def sfru_forward(x_nchw, ln, cw, gm, gv):
    Bn, Cn, Hn, Wn = x_nchw.shape
    Sn = Hn * Wn
    xf = x_nchw.reshape(Bn, Cn, Sn).astype(jnp.float32)   # lane-dense (B, C, H*W)
    out = pl.pallas_call(
        _sfru_kernel,
        out_shape=jax.ShapeDtypeStruct((Bn, Cn, Sn), jnp.float32),
        grid=(Bn,),
        in_specs=[
            pl.BlockSpec((None, Cn, Sn), lambda b: (b, 0, 0)),        # x: one sample per step
            pl.BlockSpec((2, Cn, Sn), lambda b: (0, 0, 0)),           # layernorm slab
            pl.BlockSpec((2, Cn, Cn), lambda b: (0, 0, 0)),           # conv_wise slab
            pl.BlockSpec((Cn, 2 * MID + 1), lambda b: (0, 0)),        # gate matrix slab
            pl.BlockSpec((3, MID), lambda b: (0, 0)),                 # gate vector slab
        ],
        out_specs=pl.BlockSpec((None, Cn, Sn), lambda b: (b, 0, 0)),
        compiler_params=pltpu.CompilerParams(
            dimension_semantics=("parallel",)),                       # v7x: one sample per TC
    )(xf, ln, cw, gm, gv)
    return out.reshape(Bn, Cn, Hn, Wn)                                # restore NCHW


def sfru_reference(x, p):
    """Pure-JAX reference of SFRU.forward (same math, no Pallas)."""
    Bn, Cn, Hn, Wn = x.shape
    xf = x.reshape(Bn, Cn, Hn * Wn).astype(jnp.float32)
    ln_w = p["ln_w"].reshape(Cn, -1)
    ln_b = p["ln_b"].reshape(Cn, -1)
    mu = jnp.mean(xf, axis=(1, 2), keepdims=True)
    var = jnp.mean((xf - mu) ** 2, axis=(1, 2), keepdims=True)
    x_la = (xf - mu) * jax.lax.rsqrt(var + EPS) * ln_w + ln_b
    x_out = x_la * jax.nn.sigmoid(ln_w * x_la)
    gap = jnp.mean(x_out, axis=2)                                     # (B, C)
    y = gap @ p["fc1_w"].T + p["fc1_b"]                               # (B, MID)
    my = jnp.mean(y, axis=1, keepdims=True)
    vy = jnp.mean((y - my) ** 2, axis=1, keepdims=True)
    y = (y - my) * jax.lax.rsqrt(vy + EPS) * p["n1_w"] + p["n1_b"]
    y = jnp.maximum(y, 0.0)
    gate = jax.nn.sigmoid(y @ p["fc2_w"].T + p["fc2_b"])              # (B, C)
    g = gate[:, :, None]
    xo1 = jnp.einsum("oc,bcs->bos", p["cw1"], x_out * g)
    xo2 = jnp.einsum("oc,bcs->bos", p["cw2"], x_out * (1.0 - g))
    out = x_out * jax.nn.sigmoid(xo1 * xo2)
    return out.reshape(Bn, Cn, Hn, Wn)


if __name__ == "__main__":
    key = jax.random.PRNGKey(0)
    kx, kp = jax.random.split(key)
    x = jax.random.normal(kx, (B, C, H, W), dtype=jnp.float32)
    params = init_params(kp)
    ln, cw, gm, gv = pack_params(params)

    out = sfru_forward(x, ln, cw, gm, gv)
    jax.block_until_ready(out)

    assert out.shape == (B, C, H, W)
    assert bool(jnp.all(jnp.isfinite(out)))

    ref = sfru_reference(x, params)
    max_diff = float(jnp.max(jnp.abs(out - ref)))
    assert max_diff < 1e-3, f"kernel/reference mismatch: {max_diff}"

    print("KERNEL_OK")
</pallas_src>

<mosaic_0001>
module attributes {stable_mosaic.version = 11 : i64} {
  func.func @_sfru_kernel(%arg0: i32, %arg1: memref<1x32x128xf32, #tpu.memory_space<vmem>>, %arg2: memref<2x32x128xf32, #tpu.memory_space<vmem>>, %arg3: memref<2x32x32xf32, #tpu.memory_space<vmem>>, %arg4: memref<32x5xf32, #tpu.memory_space<vmem>>, %arg5: memref<3x2xf32, #tpu.memory_space<vmem>>, %arg6: memref<1x32x128xf32, #tpu.memory_space<vmem>>) attributes {dimension_semantics = [#tpu.dimension_semantics<parallel>], iteration_bounds = array<i64: 2>, scalar_prefetch = 0 : i64, scratch_operands = 0 : i64, tpu.core_type = #tpu.core_type<tc>, window_params = [{transform_indices = @transform_0, window_bounds = array<i64: 1, 32, 128>}, {pipeline_mode = #tpu.pipeline_mode<synchronous>, transform_indices = @transform_1, window_bounds = array<i64: 2, 32, 128>}, {pipeline_mode = #tpu.pipeline_mode<synchronous>, transform_indices = @transform_2, window_bounds = array<i64: 2, 32, 32>}, {pipeline_mode = #tpu.pipeline_mode<synchronous>, transform_indices = @transform_3, window_bounds = array<i64: 32, 5>}, {pipeline_mode = #tpu.pipeline_mode<synchronous>, transform_indices = @transform_4, window_bounds = array<i64: 3, 2>}, {transform_indices = @transform_5, window_bounds = array<i64: 1, 32, 128>}]} {
    %c0 = arith.constant 0 : index
    %c0_0 = arith.constant 0 : index
    %c0_1 = arith.constant 0 : index
    %0 = vector.load %arg1[%c0, %c0_0, %c0_1] : memref<1x32x128xf32, #tpu.memory_space<vmem>>, vector<1x32x128xf32>
    %1 = vector.shape_cast %0 : vector<1x32x128xf32> to vector<32x128xf32>
    %c0_2 = arith.constant 0 : index
    %c0_3 = arith.constant 0 : index
    %c0_4 = arith.constant 0 : index
    %2 = vector.load %arg2[%c0_2, %c0_3, %c0_4] : memref<2x32x128xf32, #tpu.memory_space<vmem>>, vector<1x32x128xf32>
    %3 = vector.shape_cast %2 : vector<1x32x128xf32> to vector<32x128xf32>
    %c1 = arith.constant 1 : index
    %c0_5 = arith.constant 0 : index
    %c0_6 = arith.constant 0 : index
    %4 = vector.load %arg2[%c1, %c0_5, %c0_6] : memref<2x32x128xf32, #tpu.memory_space<vmem>>, vector<1x32x128xf32>
    %5 = vector.shape_cast %4 : vector<1x32x128xf32> to vector<32x128xf32>
    %cst = arith.constant dense<0.000000e+00> : vector<32xf32>
    %6 = vector.multi_reduction <add>, %1, %cst [1] : vector<32x128xf32> to vector<32xf32>
    %7 = vector.shape_cast %6 : vector<32xf32> to vector<32x1xf32>
    %cst_7 = arith.constant 1.280000e+02 : f32
    %8 = vector.broadcast %cst_7 : f32 to vector<32x1xf32>
    %9 = arith.divf %7, %8 : vector<32x1xf32>
    %cst_8 = arith.constant dense<0.000000e+00> : vector<1xf32>
    %10 = vector.multi_reduction <add>, %9, %cst_8 [0] : vector<32x1xf32> to vector<1xf32>
    %11 = vector.shape_cast %10 : vector<1xf32> to vector<1x1xf32>
    %cst_9 = arith.constant 3.200000e+01 : f32
    %12 = vector.broadcast %cst_9 : f32 to vector<1x1xf32>
    %13 = arith.divf %11, %12 : vector<1x1xf32>
    %14 = vector.broadcast %13 : vector<1x1xf32> to vector<32x128xf32>
    %15 = arith.subf %1, %14 : vector<32x128xf32>
    %16 = arith.mulf %15, %15 : vector<32x128xf32>
    %cst_10 = arith.constant dense<0.000000e+00> : vector<32xf32>
    %17 = vector.multi_reduction <add>, %16, %cst_10 [1] : vector<32x128xf32> to vector<32xf32>
    %18 = vector.shape_cast %17 : vector<32xf32> to vector<32x1xf32>
    %cst_11 = arith.constant 1.280000e+02 : f32
    %19 = vector.broadcast %cst_11 : f32 to vector<32x1xf32>
    %20 = arith.divf %18, %19 : vector<32x1xf32>
    %cst_12 = arith.constant dense<0.000000e+00> : vector<1xf32>
    %21 = vector.multi_reduction <add>, %20, %cst_12 [0] : vector<32x1xf32> to vector<1xf32>
    %22 = vector.shape_cast %21 : vector<1xf32> to vector<1x1xf32>
    %cst_13 = arith.constant 3.200000e+01 : f32
    %23 = vector.broadcast %cst_13 : f32 to vector<1x1xf32>
    %24 = arith.divf %22, %23 : vector<1x1xf32>
    %cst_14 = arith.constant 9.99999974E-6 : f32
    %25 = vector.broadcast %cst_14 : f32 to vector<1x1xf32>
    %26 = arith.addf %24, %25 : vector<1x1xf32>
    %27 = math.rsqrt %26 : vector<1x1xf32>
    %28 = vector.broadcast %27 : vector<1x1xf32> to vector<32x128xf32>
    %29 = arith.mulf %15, %28 : vector<32x128xf32>
    %30 = arith.mulf %29, %3 : vector<32x128xf32>
    %31 = arith.addf %30, %5 : vector<32x128xf32>
    %32 = arith.mulf %3, %31 : vector<32x128xf32>
    %33 = arith.negf %32 : vector<32x128xf32>
    %34 = math.exp %33 : vector<32x128xf32>
    %cst_15 = arith.constant 1.000000e+00 : f32
    %35 = vector.broadcast %cst_15 : f32 to vector<32x128xf32>
    %36 = arith.addf %35, %34 : vector<32x128xf32>
    %37 = arith.divf %35, %36 : vector<32x128xf32>
    %38 = arith.mulf %31, %37 : vector<32x128xf32>
    %cst_16 = arith.constant dense<0.000000e+00> : vector<32xf32>
    %39 = vector.multi_reduction <add>, %38, %cst_16 [1] : vector<32x128xf32> to vector<32xf32>
    %40 = vector.shape_cast %39 : vector<32xf32> to vector<32x1xf32>
    %cst_17 = arith.constant 1.280000e+02 : f32
    %41 = vector.broadcast %cst_17 : f32 to vector<32x1xf32>
    %42 = arith.divf %40, %41 : vector<32x1xf32>
    %c0_18 = arith.constant 0 : index
    %c0_19 = arith.constant 0 : index
    %43 = vector.load %arg4[%c0_18, %c0_19] : memref<32x5xf32, #tpu.memory_space<vmem>>, vector<32x2xf32>
    %c0_20 = arith.constant 0 : index
    %c2 = arith.constant 2 : index
    %44 = vector.load %arg4[%c0_20, %c2] : memref<32x5xf32, #tpu.memory_space<vmem>>, vector<32x2xf32>
    %c0_21 = arith.constant 0 : index
    %c4 = arith.constant 4 : index
    %45 = vector.load %arg4[%c0_21, %c4] : memref<32x5xf32, #tpu.memory_space<vmem>>, vector<32x1xf32>
    %c0_22 = arith.constant 0 : index
    %c0_23 = arith.constant 0 : index
    %46 = vector.load %arg5[%c0_22, %c0_23] : memref<3x2xf32, #tpu.memory_space<vmem>>, vector<1x2xf32>
    %c1_24 = arith.constant 1 : index
    %c0_25 = arith.constant 0 : index
    %47 = vector.load %arg5[%c1_24, %c0_25] : memref<3x2xf32, #tpu.memory_space<vmem>>, vector<1x2xf32>
    %c2_26 = arith.constant 2 : index
    %c0_27 = arith.constant 0 : index
    %48 = vector.load %arg5[%c2_26, %c0_27] : memref<3x2xf32, #tpu.memory_space<vmem>>, vector<1x2xf32>
    %49 = vector.broadcast %42 : vector<32x1xf32> to vector<32x2xf32>
    %50 = arith.mulf %43, %49 : vector<32x2xf32>
    %cst_28 = arith.constant dense<0.000000e+00> : vector<2xf32>
    %51 = vector.multi_reduction <add>, %50, %cst_28 [0] : vector<32x2xf32> to vector<2xf32>
    %52 = vector.shape_cast %51 : vector<2xf32> to vector<1x2xf32>
    %53 = arith.addf %52, %46 : vector<1x2xf32>
    %cst_29 = arith.constant dense<0.000000e+00> : vector<1xf32>
    %54 = vector.multi_reduction <add>, %53, %cst_29 [1] : vector<1x2xf32> to vector<1xf32>
    %55 = vector.shape_cast %54 : vector<1xf32> to vector<1x1xf32>
    %cst_30 = arith.constant 2.000000e+00 : f32
    %56 = vector.broadcast %cst_30 : f32 to vector<1x1xf32>
    %57 = arith.divf %55, %56 : vector<1x1xf32>
    %58 = vector.broadcast %57 : vector<1x1xf32> to vector<1x2xf32>
    %59 = arith.subf %53, %58 : vector<1x2xf32>
    %60 = arith.mulf %59, %59 : vector<1x2xf32>
    %cst_31 = arith.constant dense<0.000000e+00> : vector<1xf32>
    %61 = vector.multi_reduction <add>, %60, %cst_31 [1] : vector<1x2xf32> to vector<1xf32>
    %62 = vector.shape_cast %61 : vector<1xf32> to vector<1x1xf32>
    %cst_32 = arith.constant 2.000000e+00 : f32
    %63 = vector.broadcast %cst_32 : f32 to vector<1x1xf32>
    %64 = arith.divf %62, %63 : vector<1x1xf32>
    %cst_33 = arith.constant 9.99999974E-6 : f32
    %65 = vector.broadcast %cst_33 : f32 to vector<1x1xf32>
    %66 = arith.addf %64, %65 : vector<1x1xf32>
    %67 = math.rsqrt %66 : vector<1x1xf32>
    %68 = vector.broadcast %67 : vector<1x1xf32> to vector<1x2xf32>
    %69 = arith.mulf %59, %68 : vector<1x2xf32>
    %70 = arith.mulf %69, %47 : vector<1x2xf32>
    %71 = arith.addf %70, %48 : vector<1x2xf32>
    %cst_34 = arith.constant 0.000000e+00 : f32
    %72 = vector.broadcast %cst_34 : f32 to vector<1x2xf32>
    %73 = arith.maximumf %71, %72 : vector<1x2xf32>
    %74 = vector.broadcast %73 : vector<1x2xf32> to vector<32x2xf32>
    %75 = arith.mulf %44, %74 : vector<32x2xf32>
    %cst_35 = arith.constant dense<0.000000e+00> : vector<32xf32>
    %76 = vector.multi_reduction <add>, %75, %cst_35 [1] : vector<32x2xf32> to vector<32xf32>
    %77 = vector.shape_cast %76 : vector<32xf32> to vector<32x1xf32>
    %78 = arith.addf %77, %45 : vector<32x1xf32>
    %79 = arith.negf %78 : vector<32x1xf32>
    %80 = math.exp %79 : vector<32x1xf32>
    %cst_36 = arith.constant 1.000000e+00 : f32
    %81 = vector.broadcast %cst_36 : f32 to vector<32x1xf32>
    %82 = arith.addf %81, %80 : vector<32x1xf32>
    %83 = arith.divf %81, %82 : vector<32x1xf32>
    %84 = vector.broadcast %83 : vector<32x1xf32> to vector<32x128xf32>
    %85 = arith.mulf %38, %84 : vector<32x128xf32>
    %cst_37 = arith.constant 1.000000e+00 : f32
    %86 = vector.broadcast %cst_37 : f32 to vector<32x1xf32>
    %87 = arith.subf %86, %83 : vector<32x1xf32>
    %88 = vector.broadcast %87 : vector<32x1xf32> to vector<32x128xf32>
    %89 = arith.mulf %38, %88 : vector<32x128xf32>
    %c0_38 = arith.constant 0 : index
    %c0_39 = arith.constant 0 : index
    %c0_40 = arith.constant 0 : index
    %90 = vector.load %arg3[%c0_38, %c0_39, %c0_40] : memref<2x32x32xf32, #tpu.memory_space<vmem>>, vector<1x32x32xf32>
    %91 = vector.shape_cast %90 : vector<1x32x32xf32> to vector<32x32xf32>
    %cst_41 = arith.constant dense<0.000000e+00> : vector<32x128xf32>
    %92 = tpu.matmul %91, %85, %cst_41 {dimension_numbers = #tpu.dot_dimension_numbers<[1], [0], [0], [1], [0, 0, 1, 1], [], []>} : vector<32x32xf32>, vector<32x128xf32>, vector<32x128xf32> -> vector<32x128xf32>
    %c1_42 = arith.constant 1 : index
    %c0_43 = arith.constant 0 : index
    %c0_44 = arith.constant 0 : index
    %93 = vector.load %arg3[%c1_42, %c0_43, %c0_44] : memref<2x32x32xf32, #tpu.memory_space<vmem>>, vector<1x32x32xf32>
    %94 = vector.shape_cast %93 : vector<1x32x32xf32> to vector<32x32xf32>
    %cst_45 = arith.constant dense<0.000000e+00> : vector<32x128xf32>
    %95 = tpu.matmul %94, %89, %cst_45 {dimension_numbers = #tpu.dot_dimension_numbers<[1], [0], [0], [1], [0, 0, 1, 1], [], []>} : vector<32x32xf32>, vector<32x128xf32>, vector<32x128xf32> -> vector<32x128xf32>
    %96 = arith.mulf %92, %95 : vector<32x128xf32>
    %97 = arith.negf %96 : vector<32x128xf32>
    %98 = math.exp %97 : vector<32x128xf32>
    %cst_46 = arith.constant 1.000000e+00 : f32
    %99 = vector.broadcast %cst_46 : f32 to vector<32x128xf32>
    %100 = arith.addf %99, %98 : vector<32x128xf32>
    %101 = arith.divf %99, %100 : vector<32x128xf32>
    %102 = arith.mulf %38, %101 : vector<32x128xf32>
    %c0_47 = arith.constant 0 : index
    %c0_48 = arith.constant 0 : index
    %c0_49 = arith.constant 0 : index
    %103 = vector.load %arg6[%c0_47, %c0_48, %c0_49] : memref<1x32x128xf32, #tpu.memory_space<vmem>>, vector<1x32x128xf32>
    %104 = vector.shape_cast %103 : vector<1x32x128xf32> to vector<32x128xf32>
    %105 = vector.shape_cast %102 : vector<32x128xf32> to vector<1x32x128xf32>
    tpu.vector_store %arg6[%c0_47, %c0_48, %c0_49], %105 {strides = array<i32>} : memref<1x32x128xf32, #tpu.memory_space<vmem>>, vector<1x32x128xf32>,
    return
  }
  func.func @transform_0(%arg0: i32) -> (i32, i32, i32) {
    %c0_i32 = arith.constant 0 : i32
    %c0_i32_0 = arith.constant 0 : i32
    %c0_i32_1 = arith.constant 0 : i32
    return %arg0, %c0_i32, %c0_i32_0 : i32, i32, i32
  }
  func.func @transform_1(%arg0: i32) -> (i32, i32, i32) {
    %c0_i32 = arith.constant 0 : i32
    %c0_i32_0 = arith.constant 0 : i32
    %c0_i32_1 = arith.constant 0 : i32
    %c0_i32_2 = arith.constant 0 : i32
    return %c0_i32, %c0_i32_0, %c0_i32_1 : i32, i32, i32
  }
  func.func @transform_2(%arg0: i32) -> (i32, i32, i32) {
    %c0_i32 = arith.constant 0 : i32
    %c0_i32_0 = arith.constant 0 : i32
    %c0_i32_1 = arith.constant 0 : i32
    %c0_i32_2 = arith.constant 0 : i32
    return %c0_i32, %c0_i32_0, %c0_i32_1 : i32, i32, i32
  }
  func.func @transform_3(%arg0: i32) -> (i32, i32) {
    %c0_i32 = arith.constant 0 : i32
    %c0_i32_0 = arith.constant 0 : i32
    %c0_i32_1 = arith.constant 0 : i32
    return %c0_i32, %c0_i32_0 : i32, i32
  }
  func.func @transform_4(%arg0: i32) -> (i32, i32) {
    %c0_i32 = arith.constant 0 : i32
    %c0_i32_0 = arith.constant 0 : i32
    %c0_i32_1 = arith.constant 0 : i32
    return %c0_i32, %c0_i32_0 : i32, i32
  }
  func.func @transform_5(%arg0: i32) -> (i32, i32, i32) {
    %c0_i32 = arith.constant 0 : i32
    %c0_i32_0 = arith.constant 0 : i32
    %c0_i32_1 = arith.constant 0 : i32
    return %arg0, %c0_i32, %c0_i32_0 : i32, i32, i32
  }
}

</mosaic_0001>

<bundles_post_ra>
// kernel: sfru_forward.1
= control target key start
LH: loop header
LB: loop body
LE: loop exit
PB: predicated region body
PF: predicated region fallthrough
CT: control target
= control target key end

     0   :  { %s1000_s18 = smov 0   ;;  %s1153_s0 = inlined_call_operand.vmem [shape: f32[2,32,128], index: 0, kind: input, shape index: {}]   ;;  %s1154_s1 = inlined_call_operand.vmem [shape: f32[2,32,128], index: 1, kind: input, shape index: {}]   ;;  %s1155_s2 = inlined_call_operand.vmem [shape: f32[2,32,32], index: 2, kind: input, shape index: {}]   ;;  %s1156_s3 = inlined_call_operand.vmem [shape: f32[32,5], index: 3, kind: input, shape index: {}]   ;;  %s1157_s4 = inlined_call_operand.vmem [shape: f32[3,2], index: 4, kind: input, shape index: {}]   ;;  %s1158_s5 = inlined_call_operand.vmem [shape: f32[2,32,128], index: 5, kind: output, shape index: {}]  }
   0x1 LB: > { %s809_s19 = sadd.s32 4294967295, %s965_s18   ;;  %p813_p0 = scmp.ge.s32.totalorder %s965_s18, 1  ;;  %s965_s18 = sphi %s1000_s18, %s15_s18  }
   0x2   : > { %p187_p1 = scmp.lt.s32.totalorder %s965_s18, 3 }
   0x4   : > { %p188_p2 = pnand %p813_p0, %p187_p1 }
   0x5   : > { %p215_p3 = scmp.lt.s32.totalorder (!%p188_p2), %s809_s19, 1  ;;  %s967_s7 = smov (!%p188_p2), 2  }
   0x6   : > { %191 = sbr.rel (%p188_p2) target bundleno = 1674 (0x68a), region = 40  ;;  %s968_s8 = smov (!%p188_p2), 126  }
   0xb   : > { %s1160_s19 = smov (!%p215_p3, %s809_s19), 1  ;;  %v230_v49 = vld [vmem:[%s1154_s1 + $0x8] sm:$0xff]  ;;  %v229_v51 = vld [vmem:[%s1154_s1] sm:$0xff]  ;;  %v232_v52 = vld [vmem:[%s1154_s1 + $0x18] sm:$0xff]  ;;  %vm361_vm0 = vcmask 15360   ;;  %vm376_vm1 = vcmask 8192  }
   0xc   : > { %s848_s20 = sshll.u32 %s1160_s19, 5  ;;  %v231_v53 = vld [vmem:[%s1154_s1 + $0x10] sm:$0xff]  ;;  %v819_v54 = vld [vmem:[%s1154_s1 + $0x28] sm:$0xff]  ;;  %v818_v59 = vld [vmem:[%s1154_s1 + $0x20] sm:$0xff]  ;;  %vm518_vm2 = vcmask 261120  }
   0xd   : > { %s219_s23 = scalar_lea.vmem %s1153_s0, %s848_s20  ;;  %v821_v60 = vld [vmem:[%s1154_s1 + $0x38] sm:$0xff]  ;;  %v820_v61 = vld [vmem:[%s1154_s1 + $0x30] sm:$0xff]  ;;  %s224_s30 = scalar_lea.vmem %s1158_s5, %s848_s20 }
   0xe   : > { %v225_v0 = vld [vmem:[%s219_s23] sm:$0xff]  ;;  %v227_v1 = vld [vmem:[%s219_s23 + $0x10] sm:$0xff]  ;;  %v226_v2 = vld [vmem:[%s219_s23 + $0x8] sm:$0xff] }
   0xf   : > { %238 = vadd.xlane.f32.xlu0 %v225_v0  ;;  %242 = vadd.xlane.f32.xlu1 %v227_v1  ;;  %v228_v3 = vld [vmem:[%s219_s23 + $0x18] sm:$0xff] }
  0x13   : > { %240 = vadd.xlane.f32.xlu0 %v226_v2  ;;  %244 = vadd.xlane.f32.xlu1 %v228_v3 }
  0x98   : > { %v239_v4 = vpop.xlane.xlu0 %238  ;;  %v243_v5 = vpop.xlane.xlu1 %242 }
  0x99   : > { %v247_v8 = vmul.f32 0.0078125, %v239_v4  ;;  %v249_v10 = vmul.f32 0.0078125, %v243_v5 }
  0x9c   : > { %v241_v6 = vpop.xlane.xlu0 %240  ;;  %v245_v7 = vpop.xlane.xlu1 %244 }
  0x9d   : > { %v248_v9 = vmul.f32 0.0078125, %v241_v6  ;;  %v250_v12 = vmul.f32 0.0078125, %v245_v7 }
  0x9f   : > { %v251_v11 = vadd.f32 %v248_v9, %v247_v8 }
  0xa1   : > { %v252_v13 = vadd.f32 %v251_v11, %v249_v10 }
  0xa3   : > { %v253_v14 = vadd.f32 %v252_v13, %v250_v12 }
  0xa5   : > { %v254_v15 = vrot.slane %v253_v14, 4 }
  0xa7   : > { %v255_v16 = vadd.f32 %v254_v15, %v253_v14 }
  0xa9   : > { %v256_v17 = vrot.slane %v255_v16, 2 }
  0xab   : > { %v257_v18 = vadd.f32 %v256_v17, %v255_v16 }
  0xad   : > { %v258_v19 = vrot.slane %v257_v18, 1 }
  0xaf   : > { %v259_v20 = vadd.f32 %v258_v19, %v257_v18 }
  0xb1   : > { %v261_v21 = vmul.f32 0.03125, %v259_v20 }
  0xb3   : > { %v263_v22 = vsub.f32 %v226_v2, %v261_v21  ;;  %v262_v23 = vsub.f32 %v225_v0, %v261_v21  ;;  %v265_v26 = vsub.f32 %v228_v3, %v261_v21  ;;  %v264_v27 = vsub.f32 %v227_v1, %v261_v21 }
  0xb5   : > { %v267_v24 = vmul.f32 %v263_v22, %v263_v22  ;;  %v266_v25 = vmul.f32 %v262_v23, %v262_v23  ;;  %v269_v28 = vmul.f32 %v265_v26, %v265_v26  ;;  %v268_v29 = vmul.f32 %v264_v27, %v264_v27 }
  0xb7   : > { %272 = vadd.xlane.f32.xlu1 %v267_v24  ;;  %270 = vadd.xlane.f32.xlu0 %v266_v25 }
  0xbb   : > { %276 = vadd.xlane.f32.xlu1 %v269_v28  ;;  %274 = vadd.xlane.f32.xlu0 %v268_v29 }
 0x140   : > { %v273_v30 = vpop.xlane.xlu1 %272  ;;  %v271_v31 = vpop.xlane.xlu0 %270 }
 0x141   : > { %v279_v32 = vmul.f32 0.0078125, %v273_v30  ;;  %v278_v33 = vmul.f32 0.0078125, %v271_v31  ;;  %v1055_v30 = vld [vmem:[%s1156_s3 + $0x8] sm:$0xff] }
 0x143   : > { %v282_v36 = vadd.f32 %v279_v32, %v278_v33  ;;  %v1060_v33 = vld [vmem:[%s1156_s3] sm:$0xff] }
 0x144   : > { %v277_v34 = vpop.xlane.xlu1 %276  ;;  %v275_v35 = vpop.xlane.xlu0 %274 }
 0x145   : > { %v280_v37 = vmul.f32 0.0078125, %v275_v35  ;;  %v281_v38 = vmul.f32 0.0078125, %v277_v34 }
 0x147   : > { %v283_v39 = vadd.f32 %v282_v36, %v280_v37 }
 0x149   : > { %v284_v40 = vadd.f32 %v283_v39, %v281_v38  ;;  %v1067_v39 = vld [vmem:[%s1156_s3 + $0x18] sm:$0xff] }
 0x14b   : > { %v285_v41 = vrot.slane %v284_v40, 4 }
 0x14d   : > { %v286_v42 = vadd.f32 %v285_v41, %v284_v40  ;;  %v1072_v41 = vld [vmem:[%s1156_s3 + $0x10] sm:$0xff] }
 0x14f   : > { %v287_v43 = vrot.slane %v286_v42, 2 }
 0x151   : > { %v288_v44 = vadd.f32 %v287_v43, %v286_v42 }
 0x153   : > { %v289_v45 = vrot.slane %v288_v44, 1 }
 0x155   : > { %v290_v46 = vadd.f32 %v289_v45, %v288_v44 }
 0x157   : > { %v291_v47 = vmul.f32 0.03125, %v290_v46 }
 0x159   : > { %v292_v48 = vadd.f32 1e-05, %v291_v47 }
 0x15b   : > { %907 = vrsqrt.f32 %v292_v48 }
 0x168   : > { %v908_v50 = vpop.eup %907 }
 0x169   : > { %v295_v55 = vmul.f32 %v908_v50, %v263_v22  ;;  %v294_v56 = vmul.f32 %v908_v50, %v262_v23  ;;  %v297_v57 = vmul.f32 %v908_v50, %v265_v26  ;;  %v296_v58 = vmul.f32 %v908_v50, %v264_v27 }
 0x16b   : > { %v299_v62 = vmul.f32 %v295_v55, %v230_v49  ;;  %v298_v63 = vmul.f32 %v294_v56, %v229_v51  ;;  %v301_v0 = vmul.f32 %v297_v57, %v232_v52  ;;  %v300_v1 = vmul.f32 %v296_v58, %v231_v53  ;;  %v354_v58 = vld [vmem:[%s1157_s4] sm:$0x1] }
 0x16d   : > { %v303_v2 = vadd.f32 %v819_v54, %v299_v62  ;;  %v302_v3 = vadd.f32 %v818_v59, %v298_v63  ;;  %v305_v4 = vadd.f32 %v821_v60, %v301_v0  ;;  %v304_v5 = vadd.f32 %v820_v61, %v300_v1 }
 0x16f   : > { %v307_v6 = vmul.f32 %v303_v2, %v230_v49  ;;  %v306_v7 = vmul.f32 %v302_v3, %v229_v51  ;;  %v309_v8 = vmul.f32 %v305_v4, %v232_v52  ;;  %v308_v9 = vmul.f32 %v304_v5, %v231_v53 }
 0x171   : > { %v823_v10 = vmul.f32 -1.442695, %v307_v6  ;;  %v822_v11 = vmul.f32 -1.442695, %v306_v7  ;;  %v825_v12 = vmul.f32 -1.442695, %v309_v8  ;;  %v394_v6 = vlaneseq }
 0x172   : > { %v824_v13 = vmul.f32 -1.442695, %v308_v9  ;;  %v355_v8 = vld [vmem:[%s1157_s4 + $0x1] sm:$0x1] }
 0x173   : > { %909 = vpow2.f32 %v823_v10  ;;  %v395_v10 = vshrl.u32 %v394_v6, 7 }
 0x174   : > { %911 = vpow2.f32 %v822_v11  ;;  %v356_v11 = vld [vmem:[%s1157_s4 + $0x2] sm:$0x1] }
 0x175   : > { %913 = vpow2.f32 %v825_v12 }
 0x176   : > { %915 = vpow2.f32 %v824_v13 }
 0x180   : > { %v910_v14 = vpop.eup %909 }
 0x181   : > { %v912_v15 = vpop.eup %911  ;;  %v323_v16 = vadd.f32 1.0, %v910_v14  ;;  %v396_v14 = vsub.s32 0, %v395_v10 }
 0x182   : > { %v914_v17 = vpop.eup %913  ;;  %v322_v18 = vadd.f32 1.0, %v912_v15 }
 0x183   : > { %v916_v19 = vpop.eup %915  ;;  %917 = vrcp.f32 %v323_v16  ;;  %v325_v20 = vadd.f32 1.0, %v914_v17 }
 0x184   : > { %919 = vrcp.f32 %v322_v18  ;;  %v324_v21 = vadd.f32 1.0, %v916_v19 }
 0x185   : > { %921 = vrcp.f32 %v325_v20 }
 0x186   : > { %923 = vrcp.f32 %v324_v21 }
 0x190   : > { %v918_v22 = vpop.eup %917 }
 0x191   : > { %v920_v23 = vpop.eup %919  ;;  %v1040_v24 = vmul.f32 %v918_v22, %v303_v2 }
 0x192   : > { %v922_v25 = vpop.eup %921  ;;  %v1042_v26 = vmul.f32 %v920_v23, %v302_v3 }
 0x193   : > { %v924_v27 = vpop.eup %923  ;;  %340 = vadd.xlane.f32.xlu1 %v1040_v24  ;;  %v1046_v28 = vmul.f32 %v922_v25, %v305_v4 }
 0x194   : > { %338 = vadd.xlane.f32.xlu0 %v1042_v26  ;;  %v1048_v29 = vmul.f32 %v924_v27, %v304_v5 }
 0x197   : > { %344 = vadd.xlane.f32.xlu1 %v1046_v28 }
 0x198   : > { %342 = vadd.xlane.f32.xlu0 %v1048_v29 }
 0x21c   : > { %v341_v31 = vpop.xlane.xlu1 %340 }
 0x21d   : > { %v347_v32 = vmul.f32 0.0078125, %v341_v31  ;;  %v339_v34 = vpop.xlane.xlu0 %338 }
 0x21e   : > { %v346_v35 = vmul.f32 0.0078125, %v339_v34 }
 0x21f   : > { %v358_v36 = vmul.f32 %v1055_v30, %v347_v32 }
 0x220   : > { %v357_v37 = vmul.f32 %v1060_v33, %v346_v35  ;;  %v345_v38 = vpop.xlane.xlu1 %344 }
 0x221   : > { %v349_v40 = vmul.f32 0.0078125, %v345_v38  ;;  %v343_v42 = vpop.xlane.xlu0 %342  ;;  %v363_v43 = vsel %vm361_vm0, %v358_v36, 0.0  ;;  %v969_v36 = vmov 4  }
 0x222   : > { %v362_v44 = vsel %vm361_vm0, %v357_v37, 0.0  ;;  %v348_v45 = vmul.f32 0.0078125, %v343_v42  ;;  %905 = vset.pattern.permute.xlu1 %v969_v36  ;;  %906 = vset.pattern.permute.xlu0 %v969_v36 }
 0x223   : > { %v360_v46 = vmul.f32 %v1067_v39, %v349_v40  ;;  %v364_v48 = vadd.f32 %v363_v43, %v362_v44 }
 0x224   : > { %v359_v47 = vmul.f32 %v1072_v41, %v348_v45 }
 0x225   : > { %v367_v51 = vsel %vm361_vm0, %v360_v46, 0.0 }
 0x226   : > { %v365_v49 = vsel %vm361_vm0, %v359_v47, 0.0 }
 0x227   : > { %v366_v50 = vadd.f32 %v365_v49, %v364_v48 }
 0x229   : > { %v368_v52 = vadd.f32 %v367_v51, %v366_v50 }
 0x22b   : > { %v369_v53 = vrot.slane %v368_v52, 4 }
 0x22d   : > { %v370_v54 = vadd.f32 %v369_v53, %v368_v52 }
 0x22f   : > { %v371_v55 = vrot.slane %v370_v54, 2 }
 0x231   : > { %v372_v56 = vadd.f32 %v371_v55, %v370_v54 }
 0x233   : > { %v373_v57 = vrot.slane %v372_v56, 1 }
 0x235   : > { %v374_v59 = vadd.f32 %v373_v57, %v372_v56 }
 0x237   : > { %v375_v60 = vadd.f32 %v374_v59, %v354_v58 }
 0x239   : > { %v377_v61 = vsel %vm376_vm1, %v375_v60, 0.0 }
 0x23a   : > { %378 = vadd.xlane.f32.xlu0 %v377_v61 }
 0x2c3   : > { %v379_v62 = vpop.xlane.xlu0 %378 }
 0x2c4   : > { %v381_v63 = vmul.f32 0.5, %v379_v62  ;;  %v514_v62 = vld [vmem:[%s1155_s2] sm:$0xff] }
 0x2c5   : > { %874 = vmatprep.mubr.msk.f32.mxu0 %vm518_vm2, %v514_v62 }
 0x2c6   : > { %v382_v0 = vsub.f32 %v375_v60, %v381_v63 }
 0x2c8   : > { %v383_v1 = vmul.f32 %v382_v0, %v382_v0 }
 0x2ca   : > { %v384_v2 = vsel %vm376_vm1, %v383_v1, 0.0 }
 0x2cb   : > { %385 = vadd.xlane.f32.xlu1 %v384_v2 }
 0x354   : > { %v386_v3 = vpop.xlane.xlu1 %385 }
 0x355   : > { %v387_v4 = vmul.f32 0.5, %v386_v3 }
 0x357   : > { %v388_v5 = vadd.f32 1e-05, %v387_v4 }
 0x359   : > { %925 = vrsqrt.f32 %v388_v5 }
 0x366   : > { %v926_v7 = vpop.eup %925 }
 0x367   : > { %v390_v9 = vmul.f32 %v926_v7, %v382_v0  ;;  %v834_v0 = vld [vmem:[%s1155_s2 + $0x20] sm:$0xff] }
 0x368   : > { %888 = vmatprep.mubr.msk.f32.mxu1 %vm518_vm2, %v834_v0 }
 0x369   : > { %v391_v12 = vmul.f32 %v390_v9, %v355_v8 }
 0x36b   : > { %v392_v13 = vadd.f32 %v391_v12, %v356_v11  ;;  %v515_v11 = vld [vmem:[%s1155_s2 + $0x8] sm:$0xff]  ;;  %v516_v12 = vld [vmem:[%s1155_s2 + $0x10] sm:$0xff] }
 0x36d   : > { %v393_v15 = vmax.f32 %v392_v13, 0.0 }
 0x36f   : > { %v397_v16 = vrot.slane %v393_v15, %v396_v14  ;;  %v517_v15 = vld [vmem:[%s1155_s2 + $0x18] sm:$0xff] }
 0x371   : > { %399 = vrot.lane.b32.xlu0 %v397_v16, %s967_s7 }
 0x3e3   : > { %v400_v17 = vpop.permute.xlu0 %399 }
 0x3e4   : > { %v405_v18 = vmul.f32 %v400_v17, %v1067_v39  ;;  %v402_v19 = vmul.f32 %v400_v17, %v1060_v33  ;;  %v404_v20 = vmul.f32 %v400_v17, %v1072_v41  ;;  %v403_v21 = vmul.f32 %v400_v17, %v1055_v30 }
 0x3e6   : > { %416 = vrot.lane.b32.xlu1 %v405_v18, %s968_s8  ;;  %410 = vrot.lane.b32.xlu0 %v402_v19, %s968_s8 }
 0x3ea   : > { %414 = vrot.lane.b32.xlu1 %v404_v20, %s968_s8  ;;  %v835_v20 = vld [vmem:[%s1155_s2 + $0x28] sm:$0xff] }
 0x3ee   : > { %412 = vrot.lane.b32.xlu1 %v403_v21, %s968_s8  ;;  %v836_v21 = vld [vmem:[%s1155_s2 + $0x30] sm:$0xff] }
 0x458   : > { %v417_v22 = vpop.permute.xlu1 %416  ;;  %v411_v34 = vpop.permute.xlu0 %410 }
 0x459   : > { %v431_v23 = vsel %vm361_vm0, %v417_v22, 0.0  ;;  %v422_v35 = vsel %vm361_vm0, %v411_v34, 0.0  ;;  %v837_v22 = vld [vmem:[%s1155_s2 + $0x38] sm:$0xff] }
 0x45a   : > { %432 = vadd.xlane.f32.xlu1 %v431_v23 }
 0x45c   : > { %v415_v25 = vpop.permute.xlu1 %414 }
 0x45d   : > { %v428_v27 = vsel %vm361_vm0, %v415_v25, 0.0 }
 0x45e   : > { %429 = vadd.xlane.f32.xlu0 %v428_v27 }
 0x460   : > { %v413_v31 = vpop.permute.xlu1 %412 }
 0x461   : > { %v425_v32 = vsel %vm361_vm0, %v413_v31, 0.0 }
 0x462   : > { %426 = vadd.xlane.f32.xlu0 %v425_v32 }
 0x466   : > { %423 = vadd.xlane.f32.xlu0 %v422_v35 }
 0x4e3   : > { %v433_v37 = vpop.xlane.xlu1 %432 }
 0x4e4   : > { %v437_v38 = vadd.f32 %v433_v37, %v1067_v39 }
 0x4e6   : > { %v829_v40 = vmul.f32 -1.442695, %v437_v38 }
 0x4e7   : > { %v430_v42 = vpop.xlane.xlu0 %429 }
 0x4e8   : > { %927 = vpow2.f32 %v829_v40  ;;  %v436_v43 = vadd.f32 %v430_v42, %v1072_v41 }
 0x4ea   : > { %v828_v44 = vmul.f32 -1.442695, %v436_v43 }
 0x4eb   : > { %v427_v45 = vpop.xlane.xlu0 %426 }
 0x4ec   : > { %929 = vpow2.f32 %v828_v44  ;;  %v435_v46 = vadd.f32 %v427_v45, %v1055_v30 }
 0x4ee   : > { %v827_v47 = vmul.f32 -1.442695, %v435_v46 }
 0x4ef   : > { %v424_v48 = vpop.xlane.xlu0 %423 }
 0x4f0   : > { %931 = vpow2.f32 %v827_v47  ;;  %v434_v49 = vadd.f32 %v424_v48, %v1060_v33 }
 0x4f2   : > { %v826_v50 = vmul.f32 -1.442695, %v434_v49 }
 0x4f4   : > { %933 = vpow2.f32 %v826_v50 }
 0x4f5   : > { %v928_v51 = vpop.eup %927 }
 0x4f6   : > { %v453_v52 = vadd.f32 1.0, %v928_v51 }
 0x4f8   : > { %935 = vrcp.f32 %v453_v52 }
 0x4f9   : > { %v930_v39 = vpop.eup %929 }
 0x4fa   : > { %v452_v53 = vadd.f32 1.0, %v930_v39 }
 0x4fc   : > { %937 = vrcp.f32 %v452_v53 }
 0x4fd   : > { %v932_v54 = vpop.eup %931 }
 0x4fe   : > { %v451_v41 = vadd.f32 1.0, %v932_v54 }
 0x500   : > { %939 = vrcp.f32 %v451_v41 }
 0x501   : > { %v934_v55 = vpop.eup %933 }
 0x502   : > { %v450_v56 = vadd.f32 1.0, %v934_v55 }
 0x504   : > { %941 = vrcp.f32 %v450_v56 }
 0x505   : > { %v936_v30 = vpop.eup %935 }
 0x506   : > { %479 = vperm.xlu1 %905, %v936_v30   ;;  %v489_v57 = vsub.f32 1.0, %v936_v30 }
 0x508   : > { %507 = vperm.xlu0 %906, %v489_v57  }
 0x509   : > { %v938_v58 = vpop.eup %937 }
 0x50a   : > { %474 = vperm.xlu1 %905, %v938_v58   ;;  %v488_v60 = vsub.f32 1.0, %v938_v58 }
 0x50d   : > { %v940_v33 = vpop.eup %939 }
 0x50e   : > { %469 = vperm.xlu1 %905, %v940_v33   ;;  %v487_v61 = vsub.f32 1.0, %v940_v33 }
 0x511   : > { %v942_v59 = vpop.eup %941 }
 0x512   : > { %464 = vperm.xlu1 %905, %v942_v59   ;;  %v486_v63 = vsub.f32 1.0, %v942_v59 }
 0x516   : > { %502 = vperm.xlu1 %905, %v488_v60  }
 0x51a   : > { %497 = vperm.xlu1 %905, %v487_v61  }
 0x51e   : > { %492 = vperm.xlu1 %905, %v486_v63  }
 0x581   : > { %v480_v1 = vpop.permute.xlu1 %479 }
 0x582   : > { %v485_v2 = vmul.f32 %v480_v1, %v1046_v28 }
 0x583   : > { %v508_v3 = vpop.permute.xlu0 %507 }
 0x584   : > { %v513_v4 = vmul.f32 %v508_v3, %v1046_v28  ;;  %866 = vmatprep.subr.mxu0 %v485_v2 }
 0x585   : > { %867 = vmatpush3.msra.mxu0 %v485_v2  ;;  %v475_v5 = vpop.permute.xlu1 %474 }
 0x586   : > { %v484_v6 = vmul.f32 %v475_v5, %v1048_v29  ;;  %880 = vmatprep.subr.mxu1 %v513_v4 }
 0x587   : > { %881 = vmatpush3.msra.mxu1 %v513_v4 }
 0x588   : > { %868 = vmatprep.subr.mxu0 %v484_v6 }
 0x589   : > { %869 = vmatpush3.msra.mxu0 %v484_v6  ;;  %v470_v7 = vpop.permute.xlu1 %469 }
 0x58a   : > { %v483_v8 = vmul.f32 %v470_v7, %v1040_v24 }
 0x58c   : > { %870 = vmatprep.subr.mxu0 %v483_v8 }
 0x58d   : > { %871 = vmatpush3.msra.mxu0 %v483_v8  ;;  %v465_v9 = vpop.permute.xlu1 %464 }
 0x58e   : > { %v482_v10 = vmul.f32 %v465_v9, %v1042_v26 }
 0x590   : > { %872 = vmatprep.subr.mxu0 %v482_v10 }
 0x591   : > { %873 = vmatpush3.msra.mxu0 %v482_v10  ;;  %v503_v13 = vpop.permute.xlu1 %502 }
 0x592   : > { %v512_v14 = vmul.f32 %v503_v13, %v1048_v29  ;;  %875 = vmatmul.mubr.msk.f32.vlgmr.msra.gmra.mxu0 %vm518_vm2, %v515_v11 }
 0x593   : > { %877 = vmatprep.mubr.msk.f32.mxu0 %vm518_vm2, %v516_v12 }
 0x594   : > { %882 = vmatprep.subr.mxu1 %v512_v14 }
 0x595   : > { %v498_v16 = vpop.permute.xlu1 %497  ;;  %883 = vmatpush3.msra.mxu1 %v512_v14 }
 0x596   : > { %v511_v17 = vmul.f32 %v498_v16, %v1040_v24  ;;  %878 = vmatmul.mubr.msk.f32.gmra.mxu0 %vm518_vm2, %v517_v15 }
 0x598   : > { %884 = vmatprep.subr.mxu1 %v511_v17 }
 0x599   : > { %v493_v18 = vpop.permute.xlu1 %492  ;;  %885 = vmatpush3.msra.mxu1 %v511_v17 }
 0x59a   : > { %v510_v19 = vmul.f32 %v493_v18, %v1042_v26 }
 0x59c   : > { %886 = vmatprep.subr.mxu1 %v510_v19 }
 0x59d   : > { %887 = vmatpush3.msra.mxu1 %v510_v19 }
 0x59e   : > { %889 = vmatmul.mubr.msk.f32.vlgmr.msra.gmra.mxu1 %vm518_vm2, %v835_v20 }
 0x59f   : > { %891 = vmatprep.mubr.msk.f32.mxu1 %vm518_vm2, %v836_v21 }
 0x5a2   : > { %892 = vmatmul.mubr.msk.f32.gmra.mxu1 %vm518_vm2, %v837_v22 }
 0x652   : > { %v876_v23 = vpop.f32.mrf.mxu0 }
 0x654   : > { %v597_v25 = vpop.f32.mrf.mxu0 }
 0x656   : > { %v879_v32 = vpop.f32.mrf.mxu0 }
 0x658   : > { %v607_v42 = vpop.f32.mrf.mxu0 }
 0x65e   : > { %v890_v27 = vpop.f32.mrf.mxu1 }
 0x65f   : > { %v719_v31 = vmul.f32 %v890_v27, %v876_v23 }
 0x660   : > { %v699_v34 = vpop.f32.mrf.mxu1 }
 0x661   : > { %v843_v35 = vmul.f32 -1.442695, %v719_v31  ;;  %v718_v36 = vmul.f32 %v699_v34, %v597_v25 }
 0x662   : > { %v893_v37 = vpop.f32.mrf.mxu1 }
 0x663   : > { %943 = vpow2.f32 %v843_v35  ;;  %v842_v38 = vmul.f32 -1.442695, %v718_v36  ;;  %v721_v40 = vmul.f32 %v893_v37, %v879_v32 }
 0x664   : > { %v709_v43 = vpop.f32.mrf.mxu1 }
 0x665   : > { %945 = vpow2.f32 %v842_v38  ;;  %v845_v44 = vmul.f32 -1.442695, %v721_v40  ;;  %v720_v45 = vmul.f32 %v709_v43, %v607_v42 }
 0x667   : > { %947 = vpow2.f32 %v845_v44  ;;  %v844_v46 = vmul.f32 -1.442695, %v720_v45 }
 0x669   : > { %949 = vpow2.f32 %v844_v46 }
 0x670   : > { %v944_v47 = vpop.eup %943 }
 0x671   : > { %v735_v48 = vadd.f32 1.0, %v944_v47 }
 0x672   : > { %v946_v49 = vpop.eup %945 }
 0x673   : > { %951 = vrcp.f32 %v735_v48  ;;  %v734_v50 = vadd.f32 1.0, %v946_v49 }
 0x674   : > { %v948_v51 = vpop.eup %947 }
 0x675   : > { %953 = vrcp.f32 %v734_v50  ;;  %v737_v52 = vadd.f32 1.0, %v948_v51 }
 0x676   : > { %v950_v39 = vpop.eup %949 }
 0x677   : > { %955 = vrcp.f32 %v737_v52  ;;  %v736_v53 = vadd.f32 1.0, %v950_v39 }
 0x679   : > { %957 = vrcp.f32 %v736_v53 }
 0x680   : > { %v952_v54 = vpop.eup %951 }
 0x681   : > { %v747_v41 = vmul.f32 %v952_v54, %v1040_v24 }
 0x682   : > { %v954_v55 = vpop.eup %953 }
 0x683   : > { %751 = vst [vmem:[%s224_s30 + $0x8] sm:$0xff] %v747_v41  ;;  %v746_v56 = vmul.f32 %v954_v55, %v1042_v26 }
 0x684   : > { %v956_v30 = vpop.eup %955 }
 0x685   : > { %750 = vst [vmem:[%s224_s30] sm:$0xff] %v746_v56  ;;  %v749_v57 = vmul.f32 %v956_v30, %v1046_v28 }
 0x686   : > { %v958_v58 = vpop.eup %957 }
 0x687   : > { %753 = vst [vmem:[%s224_s30 + $0x18] sm:$0xff] %v749_v57  ;;  %v748_v33 = vmul.f32 %v958_v58, %v1048_v29 }
 0x689   : > { %752 = vst [vmem:[%s224_s30 + $0x10] sm:$0xff] %v748_v33 }
 0x68a PF: > { %s15_s18 = sadd.s32 1, %s965_s18  }
 0x68b   : > { %p12_p4 = scmp.ge.s32.totalorder %s15_s18, 4  }
 0x68d   :  { %14 = sbr.rel (!%p12_p4) target bundleno = 1 (0x1), region = 72 }

</bundles_post_ra>
